<compile_context>
chip_gen: v7x
topology: tpu7x:2x2x1
jax: 0.10.0
libtpu: 0.0.40
codegen_flags: <defaults>
</compile_context>

<pallas_src>
import jax
import jax.numpy as jnp
from jax.experimental import pallas as pl
from jax.experimental.pallas import tpu as pltpu

_LANES = 128          # samples per slab row (lane dimension)
_ROW_W = 2 * _LANES   # interleaved [x0, x1] values per slab row
_MAX_TILE_R = 2048    # rows per grid step: 2 MiB in + 1 MiB out per step


def _linear_kernel(b_ref, w2_ref, x_ref, o_ref):
    # b_ref : SMEM (1,)             bias scalar
    # w2_ref: VMEM (256, 128)       kron(I_128, w): de-interleave + weights
    # x_ref : VMEM (TILE_R, 256)    128 samples/row, features interleaved
    # o_ref : VMEM (TILE_R, 128)    one output per sample, lane-dense
    acc = jnp.dot(x_ref[...], w2_ref[...], preferred_element_type=jnp.float32)
    o_ref[...] = (acc + b_ref[0]).astype(o_ref.dtype)


def _choose_tile_r(r_total):
    """Rows per grid step: as big as the VMEM budget allows (amortize the
    ~0.35 us per-step overhead), multiple of 8 (sublane-dense), and giving
    >= 2 grid steps when possible (v7x has 2 TensorCores)."""
    if r_total <= 8:
        return r_total                          # block == full dim (allowed)
    if r_total > _MAX_TILE_R:
        return _MAX_TILE_R
    return max(8, ((r_total + 15) // 16) * 8)   # ~ceil(r/2), rounded up to 8


def linear_pallas(x, w, b, *, min_pallas_batch=16384):
    """y = x @ w + b for Linear(2, 1).

    x: (N, 2) float32
    w: (2, 1) float32   (transposed vs PyTorch's (out, in) storage)
    b: (1,)   float32
    returns (N, 1) float32
    """
    N, K = x.shape
    assert K == 2 and w.shape == (2, 1) and b.shape == (1,)

    # Small problems: a standalone kernel's dispatch/layout overhead dominates;
    # let XLA fuse the trivial FMA instead.
    if N < min_pallas_batch:
        return x @ w + b

    # Pad batch to a multiple of 128 only when needed (one small copy); for
    # aligned N the reshape below is a free row-major view.
    n_pad = pl.cdiv(N, _LANES) * _LANES
    x_p = x if n_pad == N else jnp.pad(x, ((0, n_pad - N), (0, 0)))
    r_total = n_pad // _LANES
    x2 = x_p.reshape(r_total, _ROW_W)           # free view: 128 samples/row

    tile_r = _choose_tile_r(r_total)
    grid = (pl.cdiv(r_total, tile_r),)

    # W2[2l + f, l] = w[f, 0]: one structured matmul does the de-interleave
    # and the K=2 contraction together, keeping all tiles (8,128)-dense.
    w2 = jnp.kron(jnp.eye(_LANES, dtype=jnp.float32), w.astype(jnp.float32))

    out = pl.pallas_call(
        _linear_kernel,
        out_shape=jax.ShapeDtypeStruct((r_total, _LANES), x.dtype),
        grid=grid,
        in_specs=[
            pl.BlockSpec(memory_space=pltpu.SMEM),              # bias (1,)
            pl.BlockSpec((_ROW_W, _LANES), lambda r: (0, 0)),   # W2 (resident)
            pl.BlockSpec((tile_r, _ROW_W), lambda r: (r, 0)),   # x slab
        ],
        out_specs=pl.BlockSpec((tile_r, _LANES), lambda r: (r, 0)),
        compiler_params=pltpu.CompilerParams(
            dimension_semantics=("parallel",),   # shards rows across v7x's 2 TCs
        ),
    )(b.astype(jnp.float32), w2, x2)

    y = out.reshape(n_pad)                       # free view
    if n_pad != N:
        y = y[:N]                                # only when we had to pad
    return y.reshape(N, 1)                       # free view


if __name__ == "__main__":
    key = jax.random.PRNGKey(0)
    k_x, k_w, k_b, k_x2 = jax.random.split(key, 4)

    in_features, out_features = 2, 1
    # Deterministic init mirroring nn.Linear's default U(-1/sqrt(in), 1/sqrt(in)).
    bound = 1.0 / jnp.sqrt(jnp.float32(in_features))
    w = jax.random.uniform(k_w, (in_features, out_features), jnp.float32,
                           minval=-bound, maxval=bound)
    b = jax.random.uniform(k_b, (out_features,), jnp.float32,
                           minval=-bound, maxval=bound)

    # Small-shape demo (batch=8): force the Pallas path so the kernel runs.
    x_small = jax.random.normal(k_x, (8, in_features), jnp.float32)
    y_small = linear_pallas(x_small, w, b, min_pallas_batch=0)
    jax.block_until_ready(y_small)
    ref_small = x_small @ w + b
    assert y_small.shape == (8, out_features)
    assert jnp.allclose(y_small, ref_small, atol=1e-5, rtol=1e-5)

    # 128-aligned batch: exercises the zero-wrapper-pass, multi-step (grid=2)
    # pipelined path.
    x_big = jax.random.normal(k_x2, (2048, in_features), jnp.float32)
    y_big = linear_pallas(x_big, w, b, min_pallas_batch=0)
    jax.block_until_ready(y_big)
    ref_big = x_big @ w + b
    assert y_big.shape == (2048, out_features)
    assert jnp.allclose(y_big, ref_big, atol=1e-5, rtol=1e-5)

    print("KERNEL_OK")
</pallas_src>

<mosaic_0001>
module attributes {stable_mosaic.version = 11 : i64} {
  func.func @_linear_kernel(%arg0: i32, %arg1: memref<1xf32, #tpu.memory_space<smem>>, %arg2: memref<256x128xf32, #tpu.memory_space<vmem>>, %arg3: memref<1x256xf32, #tpu.memory_space<vmem>>, %arg4: memref<1x128xf32, #tpu.memory_space<vmem>>) attributes {dimension_semantics = [#tpu.dimension_semantics<parallel>], iteration_bounds = array<i64: 1>, scalar_prefetch = 0 : i64, scratch_operands = 0 : i64, tpu.core_type = #tpu.core_type<tc>, window_params = [{transform_indices = @transform_0, window_bounds = array<i64: 1>}, {pipeline_mode = #tpu.pipeline_mode<synchronous>, transform_indices = @transform_1, window_bounds = array<i64: 256, 128>}, {transform_indices = @transform_2, window_bounds = array<i64: 1, 256>}, {transform_indices = @transform_3, window_bounds = array<i64: 1, 128>}]} {
    %c0 = arith.constant 0 : index
    %c0_0 = arith.constant 0 : index
    %0 = vector.load %arg3[%c0, %c0_0] : memref<1x256xf32, #tpu.memory_space<vmem>>, vector<1x256xf32>
    %c0_1 = arith.constant 0 : index
    %c0_2 = arith.constant 0 : index
    %1 = vector.load %arg2[%c0_1, %c0_2] : memref<256x128xf32, #tpu.memory_space<vmem>>, vector<256x128xf32>
    %cst = arith.constant dense<0.000000e+00> : vector<1x128xf32>
    %2 = tpu.matmul %0, %1, %cst {dimension_numbers = #tpu.dot_dimension_numbers<[1], [0], [0], [1], [0, 0, 1, 1], [], []>} : vector<1x256xf32>, vector<256x128xf32>, vector<1x128xf32> -> vector<1x128xf32>
    %c0_3 = arith.constant 0 : index
    %3 = memref.load %arg1[%c0_3] : memref<1xf32, #tpu.memory_space<smem>>
    %4 = vector.broadcast %3 : f32 to vector<1x128xf32>
    %5 = arith.addf %2, %4 : vector<1x128xf32>
    %c0_4 = arith.constant 0 : index
    %c0_5 = arith.constant 0 : index
    %6 = vector.load %arg4[%c0_4, %c0_5] : memref<1x128xf32, #tpu.memory_space<vmem>>, vector<1x128xf32>
    tpu.vector_store %arg4[%c0_4, %c0_5], %5 {strides = array<i32>} : memref<1x128xf32, #tpu.memory_space<vmem>>, vector<1x128xf32>,
    return
  }
  func.func @transform_0(%arg0: i32) -> i32 {
    %c0_i32 = arith.constant 0 : i32
    %c0_i32_0 = arith.constant 0 : i32
    return %c0_i32 : i32
  }
  func.func @transform_1(%arg0: i32) -> (i32, i32) {
    %c0_i32 = arith.constant 0 : i32
    %c0_i32_0 = arith.constant 0 : i32
    %c0_i32_1 = arith.constant 0 : i32
    return %c0_i32, %c0_i32_0 : i32, i32
  }
  func.func @transform_2(%arg0: i32) -> (i32, i32) {
    %c0_i32 = arith.constant 0 : i32
    %c0_i32_0 = arith.constant 0 : i32
    return %arg0, %c0_i32 : i32, i32
  }
  func.func @transform_3(%arg0: i32) -> (i32, i32) {
    %c0_i32 = arith.constant 0 : i32
    %c0_i32_0 = arith.constant 0 : i32
    return %arg0, %c0_i32 : i32, i32
  }
}

</mosaic_0001>

<bundles_post_ra>
// kernel: tpu_custom_call.1
= control target key start
LH: loop header
LB: loop body
LE: loop exit
PB: predicated region body
PF: predicated region fallthrough
CT: control target
= control target key end

     0   :  { %9 = vsyncpa [#allocation4], 0  ;;  %s335_s0 = inlined_call_operand.<no memory space> [shape: f32[1], index: 0, kind: input, shape index: {}]   ;;  %s336_s1 = inlined_call_operand.hbm [shape: f32[256,128], index: 1, kind: input, shape index: {}]   ;;  %s337_s2 = inlined_call_operand.vmem [shape: f32[1,256], index: 2, kind: input, shape index: {}]   ;;  %s338_s3 = inlined_call_operand.hbm [shape: f32[1,128], index: 3, kind: output, shape index: {}]  }
   0x1   :  { %10 = vsyncpa [#allocation5], 0  ;;  %s281_s12 = smov [#allocation3]   ;;  %s233_s16 = scalar_lea.hbm %s336_s1, 4096 }
   0x2   :  { %s18_s13 = sshll.u32 %s281_s12, 4  ;;  %p234_p0 = scmp.ne.s32.totalorder %s336_s1, %s233_s16  ;;  %s19_s13 = int_to_ptr.vmem [resolvable:$true] %s18_s13 }
   0x3   :  { %p237_p1 = scmp.lt.u32.totalorder %s233_s16, %s336_s1 }
   0x5   :  { %p239_p2 = pnand %p237_p1, %p234_p0 }
   0x7   :  { %242 = shalt.err (!%p239_p2)
}
   0x8   :  { %s243_s21 = scalar_lea.vmem %s19_s13, 4096  ;;  %p248_p4 = scmp.lt.s32.totalorder %s19_s13, %s19_s13 }
   0x9   :  { %p244_p3 = scmp.ne.s32.totalorder %s19_s13, %s243_s21  ;;  %p249_p5 = scmp.lt.s32.totalorder %s243_s21, %s243_s21 }
   0xb   :  { %p250_p6 = por %p249_p5, %p248_p4 }
   0xd   :  { %p251_p7 = pnand %p250_p6, %p244_p3 }
   0xf   :  { %254 = shalt.err (!%p251_p7)
}
  0x10   :  { %s282_s22 = smov 128   ;;  %s283_s23 = smov 8  }
  0x11   :  { %24 = dma.hbm_to_vmem [thread:$0]  %s336_s1, 4096, %s19_s13, [#allocation4], %s282_s22, %s282_s22, %s283_s23  }
  0x12   :  { %277 = dma.done.wait [#allocation4], 4096  }
  0x13   :  { %278 = vsyncadd [#allocation4], 4294963200  ;;  %v66_v0 = vlaneseq  ;;  %v47_v1 = vld [vmem:[#allocation3 + $0x80] sm:$0xff]  ;;  %v48_v2 = vld [vmem:[#allocation3 + $0x88] sm:$0xff]  ;;  %v64_v56 = vstv %s335_s0  ;;  %s284_s28 = smov [#allocation6]  }
  0x14   :  { %v31_v3 = vld [vmem:[#allocation3] sm:$0xff]  ;;  %v197_v4 = vpack.c.bf16 %v48_v2, %v47_v1  ;;  %v32_v5 = vld [vmem:[#allocation3 + $0x8] sm:$0xff]  ;;  %v49_v6 = vld [vmem:[#allocation3 + $0x90] sm:$0xff]  ;;  %s153_s29 = sshll.u32 %s284_s28, 4  ;;  %s154_s29 = int_to_ptr.vmem [resolvable:$true] %s153_s29 }
  0x15   :  { %v50_v7 = vld [vmem:[#allocation3 + $0x98] sm:$0xff]  ;;  %v199_v8 = vpack.c.bf16 %v32_v5, %v31_v3  ;;  %v33_v10 = vld [vmem:[#allocation3 + $0x10] sm:$0xff]  ;;  %v51_v12 = vld [vmem:[#allocation3 + $0xa0] sm:$0xff]  ;;  %v67_v14 = vshrl.u32 %v66_v0, 7  ;;  %s255_s30 = scalar_lea.vmem %s154_s29, 16  ;;  %s259_s4 = scalar_lea.vmem %s154_s29, 32 }
  0x16   :  { %v201_v9 = vpack.c.bf16 %v50_v7, %v49_v6  ;;  %v34_v11 = vld [vmem:[#allocation3 + $0x18] sm:$0xff]  ;;  %198 = vmatprep.subr.bf16.mxu0 %v197_v4  ;;  %v52_v13 = vld [vmem:[#allocation3 + $0xa8] sm:$0xff]  ;;  %v35_v17 = vld [vmem:[#allocation3 + $0x20] sm:$0xff]  ;;  %p256_p8 = scmp.ne.s32.totalorder %s154_s29, %s255_s30  ;;  %p260_p9 = scmp.lt.s32.totalorder %s154_s29, %s154_s29 }
  0x17   :  { %200 = vmatpush3.bf16.msra.mxu0 %v199_v8  ;;  %v203_v15 = vpack.c.bf16 %v34_v11, %v33_v10  ;;  %v205_v16 = vpack.c.bf16 %v52_v13, %v51_v12  ;;  %v36_v18 = vld [vmem:[#allocation3 + $0x28] sm:$0xff]  ;;  %v53_v19 = vld [vmem:[#allocation3 + $0xb0] sm:$0xff]  ;;  %v54_v20 = vld [vmem:[#allocation3 + $0xb8] sm:$0xff]  ;;  %v72_v21 = vsub.s32 1, %v67_v14  ;;  %v68_v52 = vsub.s32 0, %v67_v14  ;;  %p261_p10 = scmp.lt.s32.totalorder %s259_s4, %s255_s30 }
  0x18   :  { %202 = vmatprep.subr.bf16.mxu0 %v201_v9  ;;  %v207_v22 = vpack.c.bf16 %v36_v18, %v35_v17  ;;  %v209_v23 = vpack.c.bf16 %v54_v20, %v53_v19  ;;  %v37_v24 = vld [vmem:[#allocation3 + $0x30] sm:$0xff]  ;;  %v38_v25 = vld [vmem:[#allocation3 + $0x38] sm:$0xff]  ;;  %v55_v26 = vld [vmem:[#allocation3 + $0xc0] sm:$0xff] }
  0x19   :  { %v56_v27 = vld [vmem:[#allocation3 + $0xc8] sm:$0xff]  ;;  %v30_v28 = vld [vmem:[%s337_s2] sm:$0x3]  ;;  %v211_v30 = vpack.c.bf16 %v38_v25, %v37_v24  ;;  %v57_v34 = vld [vmem:[#allocation3 + $0xd0] sm:$0xff]  ;;  %p262_p11 = por %p261_p10, %p260_p9 }
  0x1a   :  { %v73_v29 = vrot.slane %v30_v28, %v72_v21  ;;  %v213_v31 = vpack.c.bf16 %v56_v27, %v55_v26  ;;  %v39_v32 = vld [vmem:[#allocation3 + $0x40] sm:$0xff]  ;;  %v40_v33 = vld [vmem:[#allocation3 + $0x48] sm:$0xff]  ;;  %v58_v35 = vld [vmem:[#allocation3 + $0xd8] sm:$0xff]  ;;  %v69_v54 = vrot.slane %v30_v28, %v68_v52 }
  0x1b   :  { %204 = vmatpush3.bf16.msra.mxu0 %v203_v15  ;;  %v215_v36 = vpack.c.bf16 %v40_v33, %v39_v32  ;;  %v217_v37 = vpack.c.bf16 %v58_v35, %v57_v34  ;;  %v41_v38 = vld [vmem:[#allocation3 + $0x50] sm:$0xff]  ;;  %v42_v39 = vld [vmem:[#allocation3 + $0x58] sm:$0xff]  ;;  %v59_v40 = vld [vmem:[#allocation3 + $0xe0] sm:$0xff]  ;;  %p263_p12 = pnand %p262_p11, %p256_p8 }
  0x1c   :  { %206 = vmatprep.subr.bf16.mxu0 %v205_v16  ;;  %140 = vmatprep.mubr.f32.mxu0 %v73_v29  ;;  %v60_v41 = vld [vmem:[#allocation3 + $0xe8] sm:$0xff]  ;;  %v219_v42 = vpack.c.bf16 %v42_v39, %v41_v38  ;;  %v43_v44 = vld [vmem:[#allocation3 + $0x60] sm:$0xff]  ;;  %v61_v46 = vld [vmem:[#allocation3 + $0xf0] sm:$0xff] }
  0x1d   :  { %v221_v43 = vpack.c.bf16 %v60_v41, %v59_v40  ;;  %v44_v45 = vld [vmem:[#allocation3 + $0x68] sm:$0xff]  ;;  %v62_v47 = vld [vmem:[#allocation3 + $0xf8] sm:$0xff]  ;;  %v45_v50 = vld [vmem:[#allocation3 + $0x70] sm:$0xff] }
  0x1e   :  { %v223_v48 = vpack.c.bf16 %v44_v45, %v43_v44  ;;  %v225_v49 = vpack.c.bf16 %v62_v47, %v61_v46  ;;  %v46_v51 = vld [vmem:[#allocation3 + $0x78] sm:$0xff] }
  0x1f   :  { %208 = vmatpush3.bf16.msra.mxu0 %v207_v22  ;;  %v227_v53 = vpack.c.bf16 %v46_v51, %v45_v50 }
  0x20   :  { %210 = vmatprep.subr.bf16.mxu0 %v209_v23 }
  0x23   :  { %212 = vmatpush3.bf16.msra.mxu0 %v211_v30 }
  0x24   :  { %214 = vmatprep.subr.bf16.mxu0 %v213_v31 }
  0x27   :  { %216 = vmatpush3.bf16.msra.mxu0 %v215_v36 }
  0x28   :  { %218 = vmatprep.subr.bf16.mxu0 %v217_v37 }
  0x2b   :  { %220 = vmatpush3.bf16.msra.mxu0 %v219_v42 }
  0x2c   :  { %222 = vmatprep.subr.bf16.mxu0 %v221_v43 }
  0x2f   :  { %224 = vmatpush3.bf16.msra.mxu0 %v223_v48 }
  0x30   :  { %226 = vmatprep.subr.bf16.mxu0 %v225_v49 }
  0x33   :  { %228 = vmatpush3.bf16.msra.mxu0 %v227_v53 }
  0x36   :  { %141 = vmatmul.mubr.f32.vlgmr.msra.gmra.mrb[0].mxu0 %v69_v54 }
 0x109   :  { %v194_v55 = vpop.f32.mrb[0].mxu0 }
 0x10a   :  { %v195_v57 = vpop.f32.mrb[1].mxu0 }
 0x10b   :  { %v196_v58 = vadd.f32 %v195_v57, %v194_v55 }
 0x10d   :  { %v143_v59 = vadd.f32 %v196_v58, %v64_v56 }
 0x10f   :  { %146 = vst [vmem:[#allocation6] sm:$0x1] %v143_v59 }
 0x110   :  { %266 = shalt.err (!%p263_p12)
}
 0x111   :  { %s267_s7 = scalar_lea.hbm %s338_s3, 16 }
 0x112   :  { %p268_p13 = scmp.ne.s32.totalorder %s338_s3, %s267_s7  ;;  %p271_p0 = scmp.lt.u32.totalorder %s267_s7, %s338_s3 }
 0x114   :  { %p273_p1 = pnand %p271_p0, %p268_p13 }
 0x116   :  { %276 = shalt.err (!%p273_p1)
}
 0x117   :  { %156 = dma.vmem_to_hbm [thread:$0]  %s154_s29, 16, %s338_s3, [#allocation5]  }
 0x118   :  { %279 = dma.done.wait [#allocation5], 16  }
 0x119   :  { %280 = vsyncadd [#allocation5], 4294967280 }
 0x11a   :  { %160 = vsyncpa [#allocation4], 1 }
 0x11b   :  { %161 = vsyncpa [#allocation5], 1 }

</bundles_post_ra>
